<compile_context>
chip_gen: v5e
topology: v5e:2x2
jax: 0.10.0
libtpu: 0.0.40
codegen_flags: <defaults>
</compile_context>

<pallas_src>
import functools

import jax
import jax.numpy as jnp
from jax import lax
from jax.experimental import pallas as pl
from jax.experimental.pallas import tpu as pltpu

LANE = 128  # TPU lane width; all channel dims are padded to this.


# ---------------------------------------------------------------------------
# Fused Pallas kernel: conv chain + final Linear (one graph per grid step)
# ---------------------------------------------------------------------------

def fused_gcn_kernel(at_ref, dinv_ref, x_ref, convw_ref, convb_ref,
                     linw_ref, linb_ref, out_ref, *, n_layers):
    at = at_ref[...]                  # (N, N) bf16, (A_bin + I)^T, values {0,1}
    dinv = dinv_ref[...]              # (N, 1) f32, deg^{-1/2}
    x = x_ref[...]                    # (N, 128) f32, lane-padded features

    # x <- D^-1/2 (A+I)^T D^-1/2 (x @ W_l) + b_l   (bias after aggregation)
    for l in range(n_layers):         # small static unroll
        xw = jnp.dot(x.astype(jnp.bfloat16), convw_ref[l],
                     preferred_element_type=jnp.float32)            # (N, 128)
        y = (xw * dinv).astype(jnp.bfloat16)                        # source scale dinv_j
        agg = jnp.dot(at, y, preferred_element_type=jnp.float32)    # sum_j a[j,k] * y[j]
        x = agg * dinv + convb_ref[l]                               # dest scale dinv_k

    # Only the last Linear head survives (output overwritten each iteration).
    out_ref[...] = (jnp.dot(x.astype(jnp.bfloat16), linw_ref[...],
                            preferred_element_type=jnp.float32)
                    + linb_ref[...])


def _vmem_limit_bytes(n, n_layers):
    # double-buffered per-graph tiles + resident weights + generous headroom
    per_graph = n * n * 2 + n * 4 + 2 * n * LANE * 4
    weights = (n_layers * LANE * LANE * 2 + n_layers * LANE * 4
               + LANE * LANE * 2 + LANE * 4)
    limit = 2 * (per_graph + weights) + (12 << 20)
    return int(min(max(limit, 16 << 20), 48 << 20))


def fused_forward(at_b, dinv_b, x_b, conv_w, conv_b, lin_w, lin_b):
    bsz, n, _ = at_b.shape
    n_layers = conv_w.shape[0]
    kernel = functools.partial(fused_gcn_kernel, n_layers=n_layers)
    return pl.pallas_call(
        kernel,
        out_shape=jax.ShapeDtypeStruct((bsz, n, LANE), jnp.float32),
        grid_spec=pltpu.PrefetchScalarGridSpec(
            num_scalar_prefetch=0,
            grid=(bsz,),
            in_specs=[
                pl.BlockSpec((None, n, n), lambda b: (b, 0, 0)),           # A^T (bf16)
                pl.BlockSpec((None, n, 1), lambda b: (b, 0, 0)),           # dinv (f32)
                pl.BlockSpec((None, n, LANE), lambda b: (b, 0, 0)),        # x (f32)
                pl.BlockSpec((n_layers, LANE, LANE), lambda b: (0, 0, 0)),  # conv W (bf16)
                pl.BlockSpec((n_layers, 1, LANE), lambda b: (0, 0, 0)),     # conv b (f32)
                pl.BlockSpec((LANE, LANE), lambda b: (0, 0)),              # last lin W (bf16)
                pl.BlockSpec((1, LANE), lambda b: (0, 0)),                 # last lin b (f32)
            ],
            out_specs=pl.BlockSpec((None, n, LANE), lambda b: (b, 0, 0)),
        ),
        compiler_params=pltpu.CompilerParams(
            dimension_semantics=("parallel",),
            vmem_limit_bytes=_vmem_limit_bytes(n, n_layers)),
    )(at_b, dinv_b, x_b, conv_w, conv_b, lin_w, lin_b)


# ---------------------------------------------------------------------------
# MyGCN parameters + forward wrappers
# ---------------------------------------------------------------------------

def init_params(key, in_channels, hidden_channels, out_channels, num_layers):
    n_conv = 1 + (num_layers - 3) + 1  # matches the ModuleList construction
    conv_dims = [(in_channels, hidden_channels)] + \
                [(hidden_channels, hidden_channels)] * (n_conv - 1)
    lin_dims = [(hidden_channels, hidden_channels)] * (n_conv - 1) + \
               [(hidden_channels, out_channels)]

    params = {"conv_w": [], "conv_b": [], "lin_w": [], "lin_b": []}
    for (ci, co) in conv_dims:
        key, k = jax.random.split(key)
        scale = (6.0 / (ci + co)) ** 0.5
        params["conv_w"].append(jax.random.uniform(k, (ci, co), jnp.float32, -scale, scale))
        params["conv_b"].append(jnp.zeros((co,), jnp.float32))
    for (ci, co) in lin_dims:
        key, k = jax.random.split(key)
        scale = (1.0 / ci) ** 0.5
        params["lin_w"].append(jax.random.uniform(k, (ci, co), jnp.float32, -scale, scale))
        key, k = jax.random.split(key)
        params["lin_b"].append(jax.random.uniform(k, (co,), jnp.float32, -scale, scale))
    return params


def _pad2(x, r, c):
    return jnp.pad(x, ((0, r - x.shape[0]), (0, c - x.shape[1])))


def _preprocess_graph(adjacent, features):
    """Binarize + self-loop + transpose the adjacency, precompute deg^{-1/2}."""
    n = adjacent.shape[0]
    a = (adjacent != 0).astype(jnp.float32)          # binarize BEFORE any narrowing cast
    a = jnp.where(jnp.eye(n, dtype=bool), 1.0, a)    # add_remaining_self_loops (w=1)
    deg = jnp.sum(a, axis=0)                         # in-degree (column sum), >= 1
    dinv = lax.rsqrt(deg).reshape(n, 1)              # deg^{-1/2}, f32
    at = a.T.astype(jnp.bfloat16)                    # {0,1} -> exact in bf16
    x = jnp.pad(features.astype(jnp.float32),
                ((0, 0), (0, LANE - features.shape[1])))
    return at, dinv, x


def _prep_weights(params):
    hidden = params["conv_w"][0].shape[1]
    out_channels = params["lin_w"][-1].shape[1]
    assert params["conv_w"][0].shape[0] <= LANE and hidden <= LANE and out_channels <= LANE
    conv_w = jnp.stack([_pad2(w, LANE, LANE) for w in params["conv_w"]]
                       ).astype(jnp.bfloat16)                                   # (L,128,128)
    conv_b = jnp.stack([jnp.pad(b, (0, LANE - b.shape[0])).reshape(1, LANE)
                        for b in params["conv_b"]]).astype(jnp.float32)         # (L,1,128)
    lin_w = _pad2(params["lin_w"][-1], LANE, LANE).astype(jnp.bfloat16)         # (128,128)
    lin_b = jnp.pad(params["lin_b"][-1],
                    (0, LANE - out_channels)).reshape(1, LANE).astype(jnp.float32)
    return conv_w, conv_b, lin_w, lin_b


def my_gcn_forward_batched(params, adjacents, features, dropout_rate=0.5):
    # Dropout only appears in the intermediate heads whose outputs are discarded.
    del dropout_rate
    out_channels = params["lin_w"][-1].shape[1]
    assert features.shape[-1] <= LANE
    at_b, dinv_b, x_b = jax.vmap(_preprocess_graph)(adjacents, features)
    conv_w, conv_b, lin_w, lin_b = _prep_weights(params)
    out_p = fused_forward(at_b, dinv_b, x_b, conv_w, conv_b, lin_w, lin_b)
    return out_p[:, :, :out_channels]


def my_gcn_forward(params, adjacent, features, dropout_rate=0.5):
    return my_gcn_forward_batched(params, adjacent[None], features[None],
                                  dropout_rate)[0]


# Pure-JAX reference (for a sanity check only).
def ref_forward(params, adjacent, features):
    a = (adjacent != 0).astype(jnp.float32)
    n = a.shape[0]
    a = a.at[jnp.arange(n), jnp.arange(n)].set(1.0)
    deg = a.sum(axis=0)
    dinv = 1.0 / jnp.sqrt(deg)
    ahat = a.T * dinv[:, None] * dinv[None, :]
    x = features.astype(jnp.float32)
    for w, b in zip(params["conv_w"], params["conv_b"]):
        x = ahat @ (x @ w) + b
    return x @ params["lin_w"][-1] + params["lin_b"][-1]


# ---------------------------------------------------------------------------

if __name__ == "__main__":
    key = jax.random.PRNGKey(0)
    B = 4             # graphs per batch (grid axis)
    N = 16            # nodes per graph
    in_channels = 8
    hidden_channels = 32
    out_channels = 8
    num_layers = 4    # -> 3 GCNConv layers, 3 Linear heads (only last used)
    dropout = 0.5

    k_adj, k_feat, k_params = jax.random.split(key, 3)

    # Symmetric random binary adjacencies (edge values are binarized anyway).
    raw = jax.random.uniform(k_adj, (B, N, N), jnp.float32)
    adj = (raw < 0.3).astype(jnp.float32)
    adjacents = jnp.maximum(adj, jnp.transpose(adj, (0, 2, 1)))
    features = jax.random.normal(k_feat, (B, N, in_channels), jnp.float32)

    params = init_params(k_params, in_channels, hidden_channels, out_channels, num_layers)

    # Batched forward (one graph per grid step).
    out_b = jax.block_until_ready(my_gcn_forward_batched(params, adjacents, features, dropout))
    assert out_b.shape == (B, N, out_channels) and out_b.dtype == jnp.float32
    for b in range(B):
        ref = ref_forward(params, adjacents[b], features[b])
        assert jnp.allclose(out_b[b], ref, rtol=5e-2, atol=5e-2), \
            f"graph {b}: max |diff| = {float(jnp.max(jnp.abs(out_b[b] - ref)))}"

    # Single-graph path (matches the module's forward signature).
    out_1 = jax.block_until_ready(my_gcn_forward(params, adjacents[0], features[0], dropout))
    ref_1 = ref_forward(params, adjacents[0], features[0])
    assert out_1.shape == (N, out_channels)
    assert jnp.allclose(out_1, ref_1, rtol=5e-2, atol=5e-2), \
        f"single graph: max |diff| = {float(jnp.max(jnp.abs(out_1 - ref_1)))}"

    print("KERNEL_OK")
</pallas_src>

<mosaic_0001>
module attributes {stable_mosaic.version = 11 : i64} {
  func.func @fused_gcn_kernel(%arg0: i32, %arg1: memref<1x16x16xbf16, #tpu.memory_space<vmem>>, %arg2: memref<1x16x1xf32, #tpu.memory_space<vmem>>, %arg3: memref<1x16x128xf32, #tpu.memory_space<vmem>>, %arg4: memref<3x128x128xbf16, #tpu.memory_space<vmem>>, %arg5: memref<3x1x128xf32, #tpu.memory_space<vmem>>, %arg6: memref<128x128xbf16, #tpu.memory_space<vmem>>, %arg7: memref<1x128xf32, #tpu.memory_space<vmem>>, %arg8: memref<1x16x128xf32, #tpu.memory_space<vmem>>) attributes {dimension_semantics = [#tpu.dimension_semantics<parallel>], iteration_bounds = array<i64: 4>, scalar_prefetch = 0 : i64, scratch_operands = 0 : i64, tpu.core_type = #tpu.core_type<tc>, window_params = [{transform_indices = @transform_0, window_bounds = array<i64: 1, 16, 16>}, {transform_indices = @transform_1, window_bounds = array<i64: 1, 16, 1>}, {transform_indices = @transform_2, window_bounds = array<i64: 1, 16, 128>}, {pipeline_mode = #tpu.pipeline_mode<synchronous>, transform_indices = @transform_3, window_bounds = array<i64: 3, 128, 128>}, {pipeline_mode = #tpu.pipeline_mode<synchronous>, transform_indices = @transform_4, window_bounds = array<i64: 3, 1, 128>}, {pipeline_mode = #tpu.pipeline_mode<synchronous>, transform_indices = @transform_5, window_bounds = array<i64: 128, 128>}, {pipeline_mode = #tpu.pipeline_mode<synchronous>, transform_indices = @transform_6, window_bounds = array<i64: 1, 128>}, {transform_indices = @transform_7, window_bounds = array<i64: 1, 16, 128>}]} {
    %c0 = arith.constant 0 : index
    %c0_0 = arith.constant 0 : index
    %c0_1 = arith.constant 0 : index
    %0 = vector.load %arg1[%c0, %c0_0, %c0_1] : memref<1x16x16xbf16, #tpu.memory_space<vmem>>, vector<1x16x16xbf16>
    %1 = vector.shape_cast %0 : vector<1x16x16xbf16> to vector<16x16xbf16>
    %c0_2 = arith.constant 0 : index
    %c0_3 = arith.constant 0 : index
    %c0_4 = arith.constant 0 : index
    %2 = vector.load %arg2[%c0_2, %c0_3, %c0_4] : memref<1x16x1xf32, #tpu.memory_space<vmem>>, vector<1x16x1xf32>
    %3 = vector.shape_cast %2 : vector<1x16x1xf32> to vector<16x1xf32>
    %c0_5 = arith.constant 0 : index
    %c0_6 = arith.constant 0 : index
    %c0_7 = arith.constant 0 : index
    %4 = vector.load %arg3[%c0_5, %c0_6, %c0_7] : memref<1x16x128xf32, #tpu.memory_space<vmem>>, vector<1x16x128xf32>
    %5 = vector.shape_cast %4 : vector<1x16x128xf32> to vector<16x128xf32>
    %6 = arith.truncf %5 : vector<16x128xf32> to vector<16x128xbf16>
    %c0_8 = arith.constant 0 : index
    %c0_9 = arith.constant 0 : index
    %c0_10 = arith.constant 0 : index
    %7 = vector.load %arg4[%c0_8, %c0_9, %c0_10] : memref<3x128x128xbf16, #tpu.memory_space<vmem>>, vector<1x128x128xbf16>
    %8 = vector.shape_cast %7 : vector<1x128x128xbf16> to vector<128x128xbf16>
    %cst = arith.constant dense<0.000000e+00> : vector<16x128xf32>
    %9 = tpu.matmul %6, %8, %cst {dimension_numbers = #tpu.dot_dimension_numbers<[1], [0], [0], [1], [0, 0, 1, 1], [], []>} : vector<16x128xbf16>, vector<128x128xbf16>, vector<16x128xf32> -> vector<16x128xf32>
    %10 = vector.broadcast %3 : vector<16x1xf32> to vector<16x128xf32>
    %11 = arith.mulf %9, %10 : vector<16x128xf32>
    %12 = arith.truncf %11 : vector<16x128xf32> to vector<16x128xbf16>
    %cst_11 = arith.constant dense<0.000000e+00> : vector<16x128xf32>
    %13 = tpu.matmul %1, %12, %cst_11 {dimension_numbers = #tpu.dot_dimension_numbers<[1], [0], [0], [1], [0, 0, 1, 1], [], []>} : vector<16x16xbf16>, vector<16x128xbf16>, vector<16x128xf32> -> vector<16x128xf32>
    %14 = vector.broadcast %3 : vector<16x1xf32> to vector<16x128xf32>
    %15 = arith.mulf %13, %14 : vector<16x128xf32>
    %c0_12 = arith.constant 0 : index
    %c0_13 = arith.constant 0 : index
    %c0_14 = arith.constant 0 : index
    %16 = vector.load %arg5[%c0_12, %c0_13, %c0_14] : memref<3x1x128xf32, #tpu.memory_space<vmem>>, vector<1x1x128xf32>
    %17 = vector.shape_cast %16 : vector<1x1x128xf32> to vector<1x128xf32>
    %18 = vector.broadcast %17 : vector<1x128xf32> to vector<16x128xf32>
    %19 = arith.addf %15, %18 : vector<16x128xf32>
    %20 = arith.truncf %19 : vector<16x128xf32> to vector<16x128xbf16>
    %c1 = arith.constant 1 : index
    %c0_15 = arith.constant 0 : index
    %c0_16 = arith.constant 0 : index
    %21 = vector.load %arg4[%c1, %c0_15, %c0_16] : memref<3x128x128xbf16, #tpu.memory_space<vmem>>, vector<1x128x128xbf16>
    %22 = vector.shape_cast %21 : vector<1x128x128xbf16> to vector<128x128xbf16>
    %cst_17 = arith.constant dense<0.000000e+00> : vector<16x128xf32>
    %23 = tpu.matmul %20, %22, %cst_17 {dimension_numbers = #tpu.dot_dimension_numbers<[1], [0], [0], [1], [0, 0, 1, 1], [], []>} : vector<16x128xbf16>, vector<128x128xbf16>, vector<16x128xf32> -> vector<16x128xf32>
    %24 = vector.broadcast %3 : vector<16x1xf32> to vector<16x128xf32>
    %25 = arith.mulf %23, %24 : vector<16x128xf32>
    %26 = arith.truncf %25 : vector<16x128xf32> to vector<16x128xbf16>
    %cst_18 = arith.constant dense<0.000000e+00> : vector<16x128xf32>
    %27 = tpu.matmul %1, %26, %cst_18 {dimension_numbers = #tpu.dot_dimension_numbers<[1], [0], [0], [1], [0, 0, 1, 1], [], []>} : vector<16x16xbf16>, vector<16x128xbf16>, vector<16x128xf32> -> vector<16x128xf32>
    %28 = vector.broadcast %3 : vector<16x1xf32> to vector<16x128xf32>
    %29 = arith.mulf %27, %28 : vector<16x128xf32>
    %c1_19 = arith.constant 1 : index
    %c0_20 = arith.constant 0 : index
    %c0_21 = arith.constant 0 : index
    %30 = vector.load %arg5[%c1_19, %c0_20, %c0_21] : memref<3x1x128xf32, #tpu.memory_space<vmem>>, vector<1x1x128xf32>
    %31 = vector.shape_cast %30 : vector<1x1x128xf32> to vector<1x128xf32>
    %32 = vector.broadcast %31 : vector<1x128xf32> to vector<16x128xf32>
    %33 = arith.addf %29, %32 : vector<16x128xf32>
    %34 = arith.truncf %33 : vector<16x128xf32> to vector<16x128xbf16>
    %c2 = arith.constant 2 : index
    %c0_22 = arith.constant 0 : index
    %c0_23 = arith.constant 0 : index
    %35 = vector.load %arg4[%c2, %c0_22, %c0_23] : memref<3x128x128xbf16, #tpu.memory_space<vmem>>, vector<1x128x128xbf16>
    %36 = vector.shape_cast %35 : vector<1x128x128xbf16> to vector<128x128xbf16>
    %cst_24 = arith.constant dense<0.000000e+00> : vector<16x128xf32>
    %37 = tpu.matmul %34, %36, %cst_24 {dimension_numbers = #tpu.dot_dimension_numbers<[1], [0], [0], [1], [0, 0, 1, 1], [], []>} : vector<16x128xbf16>, vector<128x128xbf16>, vector<16x128xf32> -> vector<16x128xf32>
    %38 = vector.broadcast %3 : vector<16x1xf32> to vector<16x128xf32>
    %39 = arith.mulf %37, %38 : vector<16x128xf32>
    %40 = arith.truncf %39 : vector<16x128xf32> to vector<16x128xbf16>
    %cst_25 = arith.constant dense<0.000000e+00> : vector<16x128xf32>
    %41 = tpu.matmul %1, %40, %cst_25 {dimension_numbers = #tpu.dot_dimension_numbers<[1], [0], [0], [1], [0, 0, 1, 1], [], []>} : vector<16x16xbf16>, vector<16x128xbf16>, vector<16x128xf32> -> vector<16x128xf32>
    %42 = vector.broadcast %3 : vector<16x1xf32> to vector<16x128xf32>
    %43 = arith.mulf %41, %42 : vector<16x128xf32>
    %c2_26 = arith.constant 2 : index
    %c0_27 = arith.constant 0 : index
    %c0_28 = arith.constant 0 : index
    %44 = vector.load %arg5[%c2_26, %c0_27, %c0_28] : memref<3x1x128xf32, #tpu.memory_space<vmem>>, vector<1x1x128xf32>
    %45 = vector.shape_cast %44 : vector<1x1x128xf32> to vector<1x128xf32>
    %46 = vector.broadcast %45 : vector<1x128xf32> to vector<16x128xf32>
    %47 = arith.addf %43, %46 : vector<16x128xf32>
    %48 = arith.truncf %47 : vector<16x128xf32> to vector<16x128xbf16>
    %c0_29 = arith.constant 0 : index
    %c0_30 = arith.constant 0 : index
    %49 = vector.load %arg6[%c0_29, %c0_30] : memref<128x128xbf16, #tpu.memory_space<vmem>>, vector<128x128xbf16>
    %cst_31 = arith.constant dense<0.000000e+00> : vector<16x128xf32>
    %50 = tpu.matmul %48, %49, %cst_31 {dimension_numbers = #tpu.dot_dimension_numbers<[1], [0], [0], [1], [0, 0, 1, 1], [], []>} : vector<16x128xbf16>, vector<128x128xbf16>, vector<16x128xf32> -> vector<16x128xf32>
    %c0_32 = arith.constant 0 : index
    %c0_33 = arith.constant 0 : index
    %51 = vector.load %arg7[%c0_32, %c0_33] : memref<1x128xf32, #tpu.memory_space<vmem>>, vector<1x128xf32>
    %52 = vector.broadcast %51 : vector<1x128xf32> to vector<16x128xf32>
    %53 = arith.addf %50, %52 : vector<16x128xf32>
    %c0_34 = arith.constant 0 : index
    %c0_35 = arith.constant 0 : index
    %c0_36 = arith.constant 0 : index
    %54 = vector.load %arg8[%c0_34, %c0_35, %c0_36] : memref<1x16x128xf32, #tpu.memory_space<vmem>>, vector<1x16x128xf32>
    %55 = vector.shape_cast %54 : vector<1x16x128xf32> to vector<16x128xf32>
    %56 = vector.shape_cast %53 : vector<16x128xf32> to vector<1x16x128xf32>
    tpu.vector_store %arg8[%c0_34, %c0_35, %c0_36], %56 {strides = array<i32>} : memref<1x16x128xf32, #tpu.memory_space<vmem>>, vector<1x16x128xf32>,
    return
  }
  func.func @transform_0(%arg0: i32) -> (i32, i32, i32) {
    %c0_i32 = arith.constant 0 : i32
    %c0_i32_0 = arith.constant 0 : i32
    %c0_i32_1 = arith.constant 0 : i32
    return %arg0, %c0_i32, %c0_i32_0 : i32, i32, i32
  }
  func.func @transform_1(%arg0: i32) -> (i32, i32, i32) {
    %c0_i32 = arith.constant 0 : i32
    %c0_i32_0 = arith.constant 0 : i32
    %c0_i32_1 = arith.constant 0 : i32
    return %arg0, %c0_i32, %c0_i32_0 : i32, i32, i32
  }
  func.func @transform_2(%arg0: i32) -> (i32, i32, i32) {
    %c0_i32 = arith.constant 0 : i32
    %c0_i32_0 = arith.constant 0 : i32
    %c0_i32_1 = arith.constant 0 : i32
    return %arg0, %c0_i32, %c0_i32_0 : i32, i32, i32
  }
  func.func @transform_3(%arg0: i32) -> (i32, i32, i32) {
    %c0_i32 = arith.constant 0 : i32
    %c0_i32_0 = arith.constant 0 : i32
    %c0_i32_1 = arith.constant 0 : i32
    %c0_i32_2 = arith.constant 0 : i32
    return %c0_i32, %c0_i32_0, %c0_i32_1 : i32, i32, i32
  }
  func.func @transform_4(%arg0: i32) -> (i32, i32, i32) {
    %c0_i32 = arith.constant 0 : i32
    %c0_i32_0 = arith.constant 0 : i32
    %c0_i32_1 = arith.constant 0 : i32
    %c0_i32_2 = arith.constant 0 : i32
    return %c0_i32, %c0_i32_0, %c0_i32_1 : i32, i32, i32
  }
  func.func @transform_5(%arg0: i32) -> (i32, i32) {
    %c0_i32 = arith.constant 0 : i32
    %c0_i32_0 = arith.constant 0 : i32
    %c0_i32_1 = arith.constant 0 : i32
    return %c0_i32, %c0_i32_0 : i32, i32
  }
  func.func @transform_6(%arg0: i32) -> (i32, i32) {
    %c0_i32 = arith.constant 0 : i32
    %c0_i32_0 = arith.constant 0 : i32
    %c0_i32_1 = arith.constant 0 : i32
    return %c0_i32, %c0_i32_0 : i32, i32
  }
  func.func @transform_7(%arg0: i32) -> (i32, i32, i32) {
    %c0_i32 = arith.constant 0 : i32
    %c0_i32_0 = arith.constant 0 : i32
    %c0_i32_1 = arith.constant 0 : i32
    return %arg0, %c0_i32, %c0_i32_0 : i32, i32, i32
  }
}

</mosaic_0001>

<bundles_post_ra>
// kernel: tpu_custom_call.1
= control target key start
LH: loop header
LB: loop body
LE: loop exit
PB: predicated region body
PF: predicated region fallthrough
CT: control target
= control target key end

     0   :  { %s1604_s0 = inlined_call_operand.hbm [shape: bf16[4,16,16], index: 0, kind: input, shape index: {}]   ;;  %s1605_s1 = inlined_call_operand.vmem [shape: f32[4,16,1], index: 1, kind: input, shape index: {}]   ;;  %s1606_s2 = inlined_call_operand.vmem [shape: f32[4,16,128], index: 2, kind: input, shape index: {}]   ;;  %s1607_s3 = inlined_call_operand.hbm [shape: bf16[3,128,128], index: 3, kind: input, shape index: {}]   ;;  %s1608_s4 = inlined_call_operand.vmem [shape: f32[3,1,128], index: 4, kind: input, shape index: {}]   ;;  %s1609_s5 = inlined_call_operand.hbm [shape: bf16[128,128], index: 5, kind: input, shape index: {}]   ;;  %s1610_s6 = inlined_call_operand.vmem [shape: f32[1,128], index: 6, kind: input, shape index: {}]   ;;  %s1611_s7 = inlined_call_operand.hbm [shape: f32[4,16,128], index: 7, kind: output, shape index: {}]  }
   0x1   :  { %1614 = sst [smem:[#allocation12_spill]] %s1607_s3 }
   0x2   :  { %12 = vsyncpa [#allocation3], 0 }
   0x3   :  { %14 = vsyncpa [#allocation3 + $0x1], 0 }
   0x4   :  { %15 = vsyncpa [#allocation6], 0 }
   0x5   :  { %16 = vsyncpa [#allocation4], 0 }
   0x6   :  { %18 = vsyncpa [#allocation4 + $0x1], 0  ;;  %s1413_s24 = smov 0   ;;  %s1415_s25 = smov 0  }
   0x7   :  { %s1417_s26 = smov 0   ;;  %s1419_s27 = smov 0  }
   0x8 LB: > { %s1434_s28 = sadd.s32 4294967295, %s1364_s27   ;;  %s931_s29 = sadd.s32 4294967294, %s1364_s27   ;;  %s1364_s27 = sphi %s1419_s27, %s1626_s27   ;;  %s1360_s26 = sphi %s1417_s26, %s1625_s26   ;;  %s1356_s25 = sphi %s1415_s25, %s1624_s25   ;;  %s1352_s24 = sphi %s1413_s24, %s1623_s24  }
   0x9   : > { %p44_p0 = scmp.ne.s32.totalorder %s1356_s25, %s1352_s24  ;;  %p45_p1 = scmp.eq.s32.totalorder %s1434_s28, 0 }
   0xa   : > { %p204_p2 = scmp.eq.s32.totalorder %s1434_s28, 3  ;;  %p210_p3 = scmp.eq.s32.totalorder %s931_s29, 3 }
   0xb   : > { %p1443_p4 = por %p45_p1, %p44_p0  ;;  %p932_p5 = scmp.ge.s32.totalorder %s1364_s27, 1 }
   0xc   : > { %p1448_p6 = por %p210_p3, %p44_p0  ;;  %p217_p7 = scmp.lt.s32.totalorder %s1364_s27, 5 }
   0xd   : > { %s1617_s3 = sld [smem:[#allocation12_spill]]  ;;  %s1366_s13 = smov [#allocation5]  }
   0xe   : > { %p1456_p8 = pnand %p932_p5, %p217_p7  ;;  %s230_s14 = sshll.u32 %s1366_s13, 4  ;;  %s231_s14 = int_to_ptr.vmem [resolvable:$true] %s230_s14 }
   0xf   : > { %s245_s17 = sshll.u32 %s1609_s5, 4  ;;  %s1612_s18 = smov 64   ;;  %s246_s17 = int_to_ptr.hbm [resolvable:$true] %s245_s17 }
  0x10   : > { %p1139_p9 = pneg %p1456_p8  ;;  %s1613_s19 = smov 4  }
  0x11   : > { %s1369_s20 = smov [#allocation7]   ;;  %s1474_s22 = sadd.s32 1, %s1364_s27  }
  0x12   : > { %p1140_p10 = pnand %p1139_p9, %p45_p1  ;;  %s247_s21 = sshll.u32 %s1369_s20, 4  ;;  %s248_s21 = int_to_ptr.vmem [resolvable:$true] %s247_s21 }
  0x13   : > { %s228_s11 = sshll.u32 %s1617_s3, 4  ;;  %s31_s23 = sadd.s32 1, %s1360_s26  ;;  %s229_s11 = int_to_ptr.hbm [resolvable:$true] %s228_s11 }
  0x14   : > { %1142 = dma.hbm_to_vmem [thread:$0]  (!%p1140_p10), %s229_s11, 3072, %s231_s14, [#allocation6], %s1612_s18, %s1612_s18, %s1613_s19  }
  0x15   : > { %1145 = dma.hbm_to_vmem [thread:$0]  (!%p1140_p10), %s246_s17, 1024, %s248_s21, [#allocation6], %s1612_s18, %s1612_s18, %s1613_s19  }
  0x16   : > { %s28_s29 = ssub.s32 %s1364_s27, %s1474_s22  ;;  %p38_p11 = scmp.ne.s32.totalorder %s1360_s26, %s1356_s25 }
  0x17   : > { %p29_p12 = scmp.eq.s32.totalorder %s28_s29, 0  ;;  %p39_p13 = scmp.eq.s32.totalorder %s1364_s27, 0 }
  0x18   : > { %p1484_p0 = por %p204_p2, %p38_p11  ;;  %p1156_p3 = scmp.lt.s32.totalorder %s1364_s27, 4 }
  0x19   : > { %s1490_s10 = scalar_select %p29_p12, %s1360_s26, %s31_s23  }
  0x1a   : > { %p40_p5 = por %p39_p13, %p38_p11  ;;  %s264_s11 = sand.u32 1, %s1360_s26  }
  0x1b   : > { %s936_s13 = sshll.u32 %s264_s11, 3  ;;  %s1090_s14 = sshll.u32 %s1364_s27, 3 }
  0x1c   : > { %s273_s17 = scalar_lea.hbm %s1604_s0, %s1090_s14  ;;  %s268_s20 = scalar_lea.vmem [#allocation2], %s936_s13 }
  0x1d   : > { %s276_s21 = sshll.u32 %s268_s20, 4  ;;  %s274_s29 = sshll.u32 %s273_s17, 4  ;;  %s277_s21 = int_to_ptr.vmem [resolvable:$true] %s276_s21  ;;  %s275_s29 = int_to_ptr.hbm [resolvable:$true] %s274_s29 }
  0x1e   : > { %p1497_p2 = pnand %p1156_p3, %p40_p5  ;;  %s265_s23 = scalar_lea.sflag [#allocation3], %s264_s11 }
  0x1f   : > { %s1264_s19 = sshra.s32 %s275_s29, 4  ;;  %s1271_s15 = scalar_lea.hbm %s1604_s0, 32  ;;  %s1265_s19 = int_to_ptr.hbm [resolvable:$true] %s1264_s19 }
  0x20   : > { %s1266_s3 = scalar_lea.hbm %s1265_s19, 8  ;;  %p1268_p9 = pneg %p1497_p2 }
  0x21   : > { %p1267_p7 = scmp.ne.s32.totalorder %s1265_s19, %s1266_s3  ;;  %p1272_p12 = scmp.lt.s32.totalorder %s1265_s19, %s1604_s0 }
  0x22   : > { %p1273_p13 = scmp.lt.s32.totalorder %s1271_s15, %s1266_s3 }
  0x23   : > { %p1269_p10 = pnand %p1268_p9, %p1267_p7 }
  0x24   : > { %p1274_p3 = por %p1273_p13, %p1272_p12 }
  0x25   : > { %p1270_p11 = pneg %p1269_p10 }
  0x27   : > { %p1275_p5 = pnand %p1274_p3, %p1270_p11 }
  0x29   : > { %1278 = shalt.err (!%p1275_p5)
}
  0x2a   : > { %s1621_s11 = smov 4   ;;  %s1622_s20 = smov 64  }
  0x2b   : > { %1149 = dma.hbm_to_vmem [thread:$0]  (!%p1497_p2), %s275_s29, 128, %s277_s21, %s265_s23, %s1622_s20, %s1622_s20, %s1621_s11  }
  0x2c   : > { %304 = sbr.rel (%p1456_p8) target bundleno = 1085 (0x43d), region = 48  ;;  %s1517_s14 = sand.u32 (!%p1456_p8), 1, %s1356_s25  }
  0x2d   : > { %s940_s19 = sshll.u32 (!%p1456_p8), %s1517_s14, 3  ;;  %s307_s3 = scalar_lea.sflag (!%p1456_p8), [#allocation3], %s1517_s14 }
  0x2e   : > { %s1521_s13 = scalar_lea.vmem (!%p1456_p8), [#allocation2], %s940_s19 }
  0x31   : > { %1339 = dma.done.wait (%p1443_p4), %s307_s3, 128  }
  0x32   : > { %1341 = vsyncadd (%p1443_p4), %s307_s3, 4294967168 }
  0x33   : > { %1343 = dma.done.wait (%p45_p1), [#allocation6], 4096  }
  0x34   : > { %1345 = vsyncadd (%p45_p1), [#allocation6], 4294963200  ;;  %p362_p8 = scmp.lt.s32.totalorder %s1434_s28, 3  ;;  %v1101_v0 = vld [vmem:[#allocation5 + $0x38] sm:$0xff]  ;;  %v1100_v1 = vld [vmem:[#allocation5 + $0x30] sm:$0xff]  ;;  %v1370_v2 = vmov 0  }
  0x35   : > { %444 = vmatpush.bf16.msra.mxu0 %v1101_v0  ;;  %1199 = vset.pattern.permute.xlu0 %v1370_v2  ;;  %v1099_v4 = vld [vmem:[#allocation5 + $0x28] sm:$0xff]  ;;  %v1098_v6 = vld [vmem:[#allocation5 + $0x20] sm:$0xff]  ;;  %v1097_v7 = vld [vmem:[#allocation5 + $0x18] sm:$0xff]  ;;  %vm476_vm0 = vcmask 130048   ;;  %s1126_s29 = sshll.u32 %s1434_s28, 4  ;;  %s800_s20 = scalar_lea.sflag [#allocation4], %s1517_s14 }
  0x36   : > { %s363_s12 = scalar_select %p362_p8, %s1434_s28, 3  ;;  %v1096_v8 = vld [vmem:[#allocation5 + $0x10] sm:$0xff]  ;;  %v1095_v9 = vld [vmem:[#allocation5 + $0x8] sm:$0xff]  ;;  %v1094_v10 = vld [vmem:[#allocation5] sm:$0xff] }
  0x37   : > { %v1109_v14 = vld [vmem:[#allocation5 + $0x78] sm:$0xff]  ;;  %v1108_v15 = vld [vmem:[#allocation5 + $0x70] sm:$0xff]  ;;  %v1107_v16 = vld [vmem:[#allocation5 + $0x68] sm:$0xff]  ;;  %s811_s15 = scalar_lea.hbm %s1611_s7, %s1126_s29 }
  0x38   : > { %s1091_s18 = sshll.u32 %s363_s12, 4  ;;  %568 = vmatpush.bf16.msra.mxu2 %v1109_v14  ;;  %v1106_v17 = vld [vmem:[#allocation5 + $0x60] sm:$0xff]  ;;  %v1093_v25 = vld [vmem:[%s1521_s13] sm:$0xff]  ;;  %v1103_v28 = vld [vmem:[#allocation5 + $0x48] sm:$0xff]  ;;  %s943_s12 = sshll.u32 %s1517_s14, 4 }
  0x39   : > { %s366_s23 = scalar_lea.vmem %s1605_s1, %s1091_s18  ;;  %445 = vmatpush.bf16.msra.mxu0 %v1100_v1  ;;  %s371_s16 = scalar_lea.vmem %s1606_s2, %s1091_s18  ;;  %v1105_v26 = vld [vmem:[#allocation5 + $0x58] sm:$0xff]  ;;  %v1104_v27 = vld [vmem:[#allocation5 + $0x50] sm:$0xff]  ;;  %v1102_v29 = vld [vmem:[#allocation5 + $0x40] sm:$0xff] }
  0x3a   : > { %v375_v3 = vld [vmem:[%s366_s23] sm:$0xff]  ;;  %v376_v5 = vld [vmem:[%s366_s23 + $0x8] sm:$0xff]  ;;  %v1115_v40 = vld [vmem:[#allocation5 + $0xa8] sm:$0xff]  ;;  %s814_s11 = sshll.u32 %s811_s15, 4  ;;  %s815_s11 = int_to_ptr.hbm [resolvable:$true] %s814_s11 }
  0x3b   : > { %460 = vperm.xlu0 %1199, %v375_v3   ;;  %v377_v11 = vld [vmem:[%s371_s16] sm:$0xff]  ;;  %v378_v12 = vld [vmem:[%s371_s16 + $0x8] sm:$0xff]  ;;  %v1114_v41 = vld [vmem:[#allocation5 + $0xa0] sm:$0xff]  ;;  %s361_s16 = scalar_lea.vmem [#allocation8], %s943_s12  ;;  %s1308_s19 = sshra.s32 %s815_s11, 4  ;;  %s1309_s19 = int_to_ptr.hbm [resolvable:$true] %s1308_s19 }
  0x3c   : > { %v379_v13 = vpack.c.bf16 %v378_v12, %v377_v11  ;;  %569 = vmatpush.bf16.msra.mxu2 %v1108_v15  ;;  %v1200_v32 = vld [vmem:[%s1608_s4] ss:$0 sm:$0xff]  ;;  %v1117_v38 = vld [vmem:[#allocation5 + $0xb8] sm:$0xff]  ;;  %v1111_v49 = vld [vmem:[#allocation5 + $0x88] sm:$0xff]  ;;  %s812_s17 = sshll.u32 %s361_s16, 4  ;;  %s1310_s28 = scalar_lea.hbm %s1309_s19, 16  ;;  %s813_s17 = int_to_ptr.vmem [resolvable:$true] %s812_s17 }
  0x3d   : > { %446 = vmatpush.bf16.msra.mxu0 %v1099_v4  ;;  %v1116_v39 = vld [vmem:[#allocation5 + $0xb0] sm:$0xff]  ;;  %v1113_v47 = vld [vmem:[#allocation5 + $0x98] sm:$0xff]  ;;  %v1110_v50 = vld [vmem:[#allocation5 + $0x80] sm:$0xff]  ;;  %p1311_p1 = scmp.ne.s32.totalorder %s1309_s19, %s1310_s28  ;;  %s1314_s12 = scalar_lea.hbm %s1611_s7, 64 }
  0x3e   : > { %v1112_v48 = vld [vmem:[#allocation5 + $0x90] sm:$0xff]  ;;  %v1125_v63 = vld [vmem:[#allocation7 + $0x38] sm:$0xff]  ;;  %v1123_v2 = vld [vmem:[#allocation7 + $0x28] sm:$0xff]  ;;  %p1315_p7 = scmp.lt.s32.totalorder %s1309_s19, %s1611_s7  ;;  %p1316_p9 = scmp.lt.s32.totalorder %s1314_s12, %s1310_s28 }
  0x3f   : > { %v1201_v53 = vld [vmem:[%s1608_s4 + $0x1] ss:$0 sm:$0xff]  ;;  %v1122_v3 = vld [vmem:[#allocation7 + $0x20] sm:$0xff]  ;;  %v1121_v4 = vld [vmem:[#allocation7 + $0x18] sm:$0xff]  ;;  %p1312_p4 = pnand %p1311_p1, %p1484_p0 }
  0x40   : > { %570 = vmatpush.bf16.msra.mxu2 %v1107_v16  ;;  %v1124_v1 = vld [vmem:[#allocation7 + $0x30] sm:$0xff]  ;;  %p1317_p10 = por %p1316_p9, %p1315_p7 }
  0x41   : > { %447 = vmatpush.bf16.msra.mxu0 %v1098_v6  ;;  %v1119_v6 = vld [vmem:[#allocation7 + $0x8] sm:$0xff]  ;;  %v1203_v16 = vld [vmem:[%s1610_s6] ss:$0 sm:$0xff]  ;;  %p1313_p2 = pneg %p1312_p4 }
  0x43   : > { %465 = vperm.xlu0 %1199, %v376_v5   ;;  %v1120_v5 = vld [vmem:[#allocation7 + $0x10] sm:$0xff]  ;;  %p1318_p11 = pnand %p1317_p10, %p1313_p2 }
  0x44   : > { %571 = vmatpush.bf16.msra.mxu2 %v1106_v17 }
  0x45   : > { %448 = vmatpush.bf16.msra.mxu0 %v1097_v7  ;;  %v1118_v7 = vld [vmem:[#allocation7] sm:$0xff] }
  0x48   : > { %572 = vmatpush.bf16.msra.mxu2 %v1105_v26 }
  0x49   : > { %449 = vmatpush.bf16.msra.mxu0 %v1096_v8 }
  0x4c   : > { %573 = vmatpush.bf16.msra.mxu2 %v1104_v27 }
  0x4d   : > { %450 = vmatpush.bf16.msra.mxu0 %v1095_v9 }
  0x50   : > { %574 = vmatpush.bf16.msra.mxu2 %v1103_v28 }
  0x51   : > { %451 = vmatpush.bf16.msra.mxu0 %v1094_v10  ;;  %v1202_v10 = vld [vmem:[%s1608_s4 + $0x2] ss:$0 sm:$0xff] }
  0x54   : > { %452 = vmatmul.bf16.vlgmr.msra.gmra.mxu0 %v379_v13  ;;  %575 = vmatpush.bf16.msra.mxu2 %v1102_v29 }
  0xad   : > { %v1539_v18 = vpop.permute.xlu0 %460 }
  0xb5   : > { %v1541_v20 = vpop.permute.xlu0 %465 }
  0xd1   : > { %v453_v19 = vpop.f32.mrf.mxu0 }
  0xd2   : > { %v468_v22 = vmul.f32 %v1539_v18, %v453_v19 }
  0xd9   : > { %v455_v21 = vpop.f32.mrf.mxu0 }
  0xda   : > { %v469_v23 = vmul.f32 %v1541_v20, %v455_v21 }
  0xdc   : > { %v470_v24 = vpack.c.bf16 %v469_v23, %v468_v22 }
  0xde   : > { %487 = vmatpush.bf16.msra.mxu1 %v470_v24 }
  0xe1   : > { %984 = vmatmul.msk.bf16.vlgmr.msra.gmra.mxu1 %vm476_vm0, %v1093_v25 }
  0xe2   : > { %674 = vmatpush.bf16.msrb.mxu1 %v1117_v38 }
  0xe6   : > { %675 = vmatpush.bf16.msrb.mxu1 %v1116_v39 }
  0xea   : > { %676 = vmatpush.bf16.msrb.mxu1 %v1115_v40 }
  0xee   : > { %677 = vmatpush.bf16.msrb.mxu1 %v1114_v41 }
  0xf2   : > { %678 = vmatpush.bf16.msrb.mxu1 %v1113_v47 }
  0xf6   : > { %679 = vmatpush.bf16.msrb.mxu1 %v1112_v48 }
  0xfa   : > { %680 = vmatpush.bf16.msrb.mxu1 %v1111_v49 }
  0xfe   : > { %681 = vmatpush.bf16.msrb.mxu1 %v1110_v50 }
 0x15e   : > { %v489_v30 = vpop.f32.mrf.mxu1 }
 0x15f   : > { %v494_v31 = vmul.f32 %v489_v30, %v1539_v18 }
 0x161   : > { %v500_v35 = vadd.f32 %v1200_v32, %v494_v31 }
 0x166   : > { %v491_v33 = vpop.f32.mrf.mxu1 }
 0x167   : > { %v495_v34 = vmul.f32 %v491_v33, %v1541_v20 }
 0x169   : > { %v501_v36 = vadd.f32 %v1200_v32, %v495_v34 }
 0x16b   : > { %v502_v37 = vpack.c.bf16 %v501_v36, %v500_v35 }
 0x16d   : > { %576 = vmatmul.bf16.vlgmr.msra.gmra.mxu2 %v502_v37 }
 0x1f0   : > { %v577_v42 = vpop.f32.mrf.mxu2 }
 0x1f1   : > { %v582_v44 = vmul.f32 %v577_v42, %v1539_v18 }
 0x1f8   : > { %v579_v43 = vpop.f32.mrf.mxu2 }
 0x1f9   : > { %v583_v45 = vmul.f32 %v579_v43, %v1541_v20 }
 0x1fb   : > { %v584_v46 = vpack.c.bf16 %v583_v45, %v582_v44 }
 0x1fd   : > { %592 = vmatpush.bf16.msrb.mxu0 %v584_v46 }
 0x200   : > { %1017 = vmatmul.msk.bf16.vlgmr.msrb.gmra.mxu0 %vm476_vm0, %v1093_v25 }
 0x27d   : > { %v594_v51 = vpop.f32.mrf.mxu0 }
 0x27e   : > { %v599_v52 = vmul.f32 %v594_v51, %v1539_v18 }
 0x280   : > { %v606_v56 = vadd.f32 %v1201_v53, %v599_v52 }
 0x285   : > { %v596_v54 = vpop.f32.mrf.mxu0 }
 0x286   : > { %v600_v55 = vmul.f32 %v596_v54, %v1541_v20 }
 0x288   : > { %v607_v57 = vadd.f32 %v1201_v53, %v600_v55 }
 0x28a   : > { %v608_v58 = vpack.c.bf16 %v607_v57, %v606_v56 }
 0x28c   : > { %682 = vmatmul.bf16.vlgmr.msrb.gmra.mxu1 %v608_v58 }
 0x309   : > { %v683_v59 = vpop.f32.mrf.mxu1 }
 0x30a   : > { %v688_v61 = vmul.f32 %v683_v59, %v1539_v18 }
 0x311   : > { %v685_v60 = vpop.f32.mrf.mxu1 }
 0x312   : > { %v689_v62 = vmul.f32 %v685_v60, %v1541_v20 }
 0x314   : > { %v690_v0 = vpack.c.bf16 %v689_v62, %v688_v61 }
 0x316   : > { %698 = vmatpush.bf16.msra.mxu3 %v690_v0 }
 0x319   : > { %1051 = vmatmul.msk.bf16.vlgmr.msra.gmra.mxu3 %vm476_vm0, %v1093_v25 }
 0x31a   : > { %783 = vmatpush.bf16.msrb.mxu3 %v1125_v63 }
 0x31e   : > { %784 = vmatpush.bf16.msrb.mxu3 %v1124_v1 }
 0x322   : > { %785 = vmatpush.bf16.msrb.mxu3 %v1123_v2 }
 0x326   : > { %786 = vmatpush.bf16.msrb.mxu3 %v1122_v3 }
 0x32a   : > { %787 = vmatpush.bf16.msrb.mxu3 %v1121_v4 }
 0x32e   : > { %788 = vmatpush.bf16.msrb.mxu3 %v1120_v5 }
 0x332   : > { %789 = vmatpush.bf16.msrb.mxu3 %v1119_v6 }
 0x336   : > { %790 = vmatpush.bf16.msrb.mxu3 %v1118_v7 }
 0x39c   : > { %v700_v8 = vpop.f32.mrf.mxu3 }
 0x39d   : > { %v705_v9 = vmul.f32 %v700_v8, %v1539_v18 }
 0x39f   : > { %v712_v13 = vadd.f32 %v1202_v10, %v705_v9 }
 0x3a4   : > { %v702_v11 = vpop.f32.mrf.mxu3 }
 0x3a5   : > { %v706_v12 = vmul.f32 %v702_v11, %v1541_v20 }
 0x3a7   : > { %v713_v14 = vadd.f32 %v1202_v10, %v706_v12 }
 0x3a9   : > { %v714_v15 = vpack.c.bf16 %v713_v14, %v712_v13 }
 0x3ab   : > { %791 = vmatmul.bf16.vlgmr.msrb.gmra.mxu3 %v714_v15 }
 0x42e   : > { %v792_v17 = vpop.f32.mrf.mxu3 }
 0x42f   : > { %v793_v18 = vadd.f32 %v1203_v16, %v792_v17 }
 0x431   : > { %797 = vst [vmem:[%s361_s16] sm:$0xff] %v793_v18 }
 0x436   : > { %v794_v19 = vpop.f32.mrf.mxu3 }
 0x437   : > { %v795_v20 = vadd.f32 %v1203_v16, %v794_v19 }
 0x439   : > { %798 = vst [vmem:[%s361_s16 + $0x8] sm:$0xff] %v795_v20 }
 0x43a   : > { %1321 = shalt.err (!%p1318_p11)
}
 0x43b   : > { %s1371_s14 = smov 128   ;;  %s1372_s29 = smov 8  }
 0x43c   : > { %1137 = dma.vmem_to_hbm [thread:$0]  (%p1484_p0), %s813_s17, 256, %s815_s11, %s800_s20, %s1371_s14, %s1371_s14, %s1372_s29  }
 0x43d PF: > { %p1159_p12 = scmp.ge.s32.totalorder %s1364_s27, 2  ;;  %s829_s23 = sand.u32 1, %s1352_s24  }
 0x43e   : > { %s830_s30 = scalar_lea.sflag [#allocation4], %s829_s23 }
 0x43f   : > { %p1151_p13 = pnand %p1159_p12, %p1448_p6 }
 0x441   : > { %p1152_p3 = pneg %p1151_p13 }
 0x443   : > { %1347 = dma.done.wait (%p1152_p3), %s830_s30, 256  }
 0x444   : > { %1349 = vsyncadd (%p1152_p3), %s830_s30, 4294967040  ;;  %p21_p5 = scmp.ge.s32.totalorder %s1474_s22, 6   ;;  %s1623_s24 = smov %s1356_s25 }
 0x445   : > { %s1624_s25 = smov %s1360_s26  ;;  %s1625_s26 = smov %s1490_s10 }
 0x446   : > { %s1626_s27 = smov %s1474_s22  ;;  %23 = sbr.rel (!%p21_p5) target bundleno = 8 (0x8), region = 111 }
 0x44b   :  { %836 = vsyncpa [#allocation3], 1 }
 0x44c   :  { %838 = vsyncpa [#allocation3 + $0x1], 1 }
 0x44d   :  { %839 = vsyncpa [#allocation6], 1 }
 0x44e   :  { %840 = vsyncpa [#allocation4], 1 }
 0x44f   :  { %842 = vsyncpa [#allocation4 + $0x1], 1 }

</bundles_post_ra>
